<compile_context>
chip_gen: v5e
topology: v5e:2x2
jax: 0.10.0
libtpu: 0.0.40
codegen_flags: <defaults>
</compile_context>

<pallas_src>
import jax
import jax.numpy as jnp
from jax.experimental import pallas as pl
from jax.experimental.pallas import tpu as pltpu

# ----- Phi-like config, scaled down -----
HIDDEN = 64
NUM_HEADS = 4
HEAD_SIZE = HIDDEN // NUM_HEADS                         # 16
PARTIAL_ROTARY_FACTOR = 0.5
ROTARY_DIM = int(PARTIAL_ROTARY_FACTOR * HEAD_SIZE)     # 8 (must be even)
ROPE_HALF = ROTARY_DIM // 2                             # 4
ROPE_THETA = 10000.0
SEQ = 16
SCALE = HEAD_SIZE ** -0.5                               # 0.25 (power of two)


def phi_attention_kernel(x_ref, wq_ref, bq_ref, wkv_ref, bkv_ref,
                         cos_ref, snl_ref, snh_ref, wo_ref, bo_ref, out_ref):
    t, hdn = x_ref.shape
    tq = out_ref.shape[0]
    nh, hs = NUM_HEADS, HEAD_SIZE

    def rope(x2d, cos_t, sin_lo, sin_hi):
        # Partial NeoX rotary applied full-width on the flattened [rows, NH*HS] layout.
        # Tables carry the sign / pass-through identity; roll wrap-around and cross-head
        # lanes always multiply zero sin entries, so the 64-lane rolls are safe.
        return (x2d * cos_t
                + jnp.roll(x2d, -ROPE_HALF, axis=1) * sin_lo
                + jnp.roll(x2d, ROPE_HALF, axis=1) * sin_hi)

    qstart = pl.multiple_of(pl.program_id(0) * tq, tq)

    # ---- qkv_proj (QKVParallelLinear, bias=True): two lane-dense 2-D matmuls, bf16 MXU / f32 acc
    xq = x_ref[pl.ds(qstart, tq), :]                                        # bf16 [tq, H]
    q2d = jnp.dot(xq, wq_ref[...], preferred_element_type=jnp.float32) + bq_ref[...]
    q2d = rope(q2d,
               cos_ref[pl.ds(qstart, tq), :],
               snl_ref[pl.ds(qstart, tq), :],
               snh_ref[pl.ds(qstart, tq), :]).astype(jnp.bfloat16)          # scale folded in wq/bq

    kv2d = jnp.dot(x_ref[...], wkv_ref[...],
                   preferred_element_type=jnp.float32) + bkv_ref[...]       # f32 [T, 2*NH*HS]
    k2d = rope(kv2d[:, :hdn], cos_ref[...], snl_ref[...], snh_ref[...]).astype(jnp.bfloat16)
    v2d = kv2d[:, hdn:].astype(jnp.bfloat16)

    # ---- head split only for the score / PV einsums (leading-batch layout) ----
    qh = jnp.stack([q2d[:, n * hs:(n + 1) * hs] for n in range(nh)], axis=0)  # [NH, tq, HS]
    kh = jnp.stack([k2d[:, n * hs:(n + 1) * hs] for n in range(nh)], axis=0)  # [NH, T,  HS]
    vh = jnp.stack([v2d[:, n * hs:(n + 1) * hs] for n in range(nh)], axis=0)  # [NH, T,  HS]

    # ---- RadixAttention (prefill): scaled causal softmax attention, f32 scores ----
    s = jnp.einsum("nqd,nkd->nqk", qh, kh, preferred_element_type=jnp.float32)  # [NH, tq, T]
    row = pl.program_id(0) * tq + jax.lax.broadcasted_iota(jnp.int32, (tq, t), 0)
    col = jax.lax.broadcasted_iota(jnp.int32, (tq, t), 1)
    s = jnp.where((row >= col)[None], s, -1e30)
    m = jnp.max(s, axis=-1, keepdims=True)
    p = jnp.exp(s - m)
    l = jnp.sum(p, axis=-1, keepdims=True)
    o = jnp.einsum("nqk,nkd->nqd", p.astype(jnp.bfloat16), vh,
                   preferred_element_type=jnp.float32)
    o = o * pl.reciprocal(l, approx=True)                                   # deferred normalization

    # ---- dense (RowParallelLinear, bias=True): back to lane-dense [tq, NH*HS], ONE matmul ----
    attn2d = jnp.concatenate([o[n] for n in range(nh)], axis=-1).astype(jnp.bfloat16)
    out = jnp.dot(attn2d, wo_ref[...], preferred_element_type=jnp.float32) + bo_ref[...]
    out_ref[...] = out.astype(out_ref.dtype)


def phi_attention(hidden_states, position_ids, wqkv, bqkv, wo, bo, *, q_tile=None):
    T, H = hidden_states.shape
    NH, HS = NUM_HEADS, HEAD_SIZE
    if q_tile is None:
        q_tile = T                     # single grid step (v5e/v6e small-T); use >=2 tiles on v7x at real dims
    assert T % q_tile == 0

    x = hidden_states.astype(jnp.bfloat16)

    # ---- weight / bias repack (layout glue, once, outside the kernel) ----
    # Columns stay head-minor packed (head n, dim d -> column n*HS + d) so the kernel's
    # projections are single lane-dense 2-D matmuls. SCALE (a power of two) is folded into
    # wq / bq: rope is linear, so scale*rope(x@W+b) == rope(x@(scale*W) + scale*b).
    wq = (SCALE * wqkv[:, :H]).astype(jnp.bfloat16)                 # [H, NH*HS]
    bq = (SCALE * bqkv[:H]).reshape(1, H).astype(jnp.float32)       # [1, NH*HS]
    wkv = wqkv[:, H:].astype(jnp.bfloat16)                          # [H, 2*NH*HS] = [wk | wv]
    bkv = bqkv[H:].reshape(1, 2 * H).astype(jnp.float32)            # [1, 2*NH*HS]
    wo2 = wo.astype(jnp.bfloat16)                                   # [NH*HS, H]
    bo2 = bo.reshape(1, H).astype(jnp.float32)

    # ---- rotary tables in the flattened [T, NH*HS] layout (per-head pattern tiled over heads).
    # cos carries the pass-through identity; snl pairs with roll(-half), snh with roll(+half).
    half = ROPE_HALF
    inv_freq = 1.0 / (ROPE_THETA ** (jnp.arange(half, dtype=jnp.float32) * 2.0 / ROTARY_DIM))
    ang = position_ids.astype(jnp.float32)[:, None] * inv_freq[None, :]      # [T, half]
    cos, sin = jnp.cos(ang), jnp.sin(ang)
    ones_pass = jnp.ones((T, HS - ROTARY_DIM), jnp.float32)
    zero_pass = jnp.zeros((T, HS - ROTARY_DIM), jnp.float32)
    zero_half = jnp.zeros((T, half), jnp.float32)
    cos_h = jnp.concatenate([cos, cos, ones_pass], axis=-1)                  # [T, HS]
    snl_h = jnp.concatenate([-sin, zero_half, zero_pass], axis=-1)
    snh_h = jnp.concatenate([zero_half, sin, zero_pass], axis=-1)
    cos_t = jnp.tile(cos_h, (1, NH))                                         # [T, NH*HS]
    snl_t = jnp.tile(snl_h, (1, NH))
    snh_t = jnp.tile(snh_h, (1, NH))

    grid = (T // q_tile,)
    const2 = lambda i: (0, 0)
    in_specs = [
        pl.BlockSpec((T, H), const2),            # x (bf16), full residency per step
        pl.BlockSpec((H, H), const2),            # wq  (bf16, scale folded)
        pl.BlockSpec((1, H), const2),            # bq  (f32, scale folded)
        pl.BlockSpec((H, 2 * H), const2),        # wkv (bf16)
        pl.BlockSpec((1, 2 * H), const2),        # bkv (f32)
        pl.BlockSpec((T, H), const2),            # cos
        pl.BlockSpec((T, H), const2),            # sin (pairs with roll(-half))
        pl.BlockSpec((T, H), const2),            # sin (pairs with roll(+half))
        pl.BlockSpec((H, H), const2),            # wo  (bf16)
        pl.BlockSpec((1, H), const2),            # bo  (f32)
    ]
    out_specs = pl.BlockSpec((q_tile, H), lambda i: (i, 0))

    return pl.pallas_call(
        phi_attention_kernel,
        out_shape=jax.ShapeDtypeStruct((T, H), jnp.float32),
        grid=grid,
        in_specs=in_specs,
        out_specs=out_specs,
        compiler_params=pltpu.CompilerParams(dimension_semantics=("parallel",)),
    )(x, wq, bq, wkv, bkv, cos_t, snl_t, snh_t, wo2, bo2)


def phi_attention_ref(hidden_states, position_ids, wqkv, bqkv, wo, bo):
    """Pure-JAX f32 reference for sanity checking."""
    half = ROPE_HALF
    inv_freq = 1.0 / (ROPE_THETA ** (jnp.arange(half, dtype=jnp.float32) * 2.0 / ROTARY_DIM))
    ang = position_ids.astype(jnp.float32)[:, None] * inv_freq[None, :]
    cos, sin = jnp.cos(ang), jnp.sin(ang)

    qkv = hidden_states @ wqkv + bqkv
    q, k, v = jnp.split(qkv, 3, axis=-1)
    T = hidden_states.shape[0]

    def rope(xx):
        xx = xx.reshape(T, NUM_HEADS, HEAD_SIZE)
        x1 = xx[..., :half]
        x2 = xx[..., half:ROTARY_DIM]
        xp = xx[..., ROTARY_DIM:]
        o1 = x1 * cos[:, None, :] - x2 * sin[:, None, :]
        o2 = x2 * cos[:, None, :] + x1 * sin[:, None, :]
        return jnp.concatenate([o1, o2, xp], axis=-1)

    qh, kh = rope(q), rope(k)
    vh = v.reshape(T, NUM_HEADS, HEAD_SIZE)
    s = jnp.einsum("thd,shd->hts", qh, kh) * SCALE
    mask = jnp.tril(jnp.ones((T, T), bool))
    s = jnp.where(mask[None], s, -1e30)
    p = jax.nn.softmax(s, axis=-1)
    o = jnp.einsum("hts,shd->thd", p, vh).reshape(T, HIDDEN)
    return o @ wo + bo


if __name__ == "__main__":
    key = jax.random.PRNGKey(0)
    k0, k1, k2, k3, k4 = jax.random.split(key, 5)

    hidden_states = jax.random.normal(k0, (SEQ, HIDDEN), jnp.float32)
    position_ids = jnp.arange(SEQ, dtype=jnp.int32)

    wqkv = jax.random.normal(k1, (HIDDEN, 3 * HIDDEN), jnp.float32) * 0.05
    bqkv = jax.random.normal(k2, (3 * HIDDEN,), jnp.float32) * 0.05
    wo = jax.random.normal(k3, (HIDDEN, HIDDEN), jnp.float32) * 0.05
    bo = jax.random.normal(k4, (HIDDEN,), jnp.float32) * 0.05

    out = phi_attention(hidden_states, position_ids, wqkv, bqkv, wo, bo)
    out = jax.block_until_ready(out)

    # Reference in f32 from the same bf16-rounded activations / weights the kernel consumes
    # (isolates kernel numerics from the intended bf16 storage; SCALE=0.25 is a power of two,
    # so folding it into wq before the bf16 round is exact).
    rd = lambda a: a.astype(jnp.bfloat16).astype(jnp.float32)
    ref = phi_attention_ref(rd(hidden_states), position_ids, rd(wqkv), bqkv, rd(wo), bo)

    assert out.shape == (SEQ, HIDDEN)
    err = float(jnp.max(jnp.abs(out - ref)))
    assert jnp.allclose(out, ref, atol=2e-2, rtol=2e-2), err

    print("KERNEL_OK")
</pallas_src>

<mosaic_0001>
module attributes {stable_mosaic.version = 11 : i64} {
  func.func @phi_attention_kernel(%arg0: i32, %arg1: memref<16x64xbf16, #tpu.memory_space<vmem>>, %arg2: memref<64x64xbf16, #tpu.memory_space<vmem>>, %arg3: memref<1x64xf32, #tpu.memory_space<vmem>>, %arg4: memref<64x128xbf16, #tpu.memory_space<vmem>>, %arg5: memref<1x128xf32, #tpu.memory_space<vmem>>, %arg6: memref<16x64xf32, #tpu.memory_space<vmem>>, %arg7: memref<16x64xf32, #tpu.memory_space<vmem>>, %arg8: memref<16x64xf32, #tpu.memory_space<vmem>>, %arg9: memref<64x64xbf16, #tpu.memory_space<vmem>>, %arg10: memref<1x64xf32, #tpu.memory_space<vmem>>, %arg11: memref<16x64xf32, #tpu.memory_space<vmem>>) attributes {dimension_semantics = [#tpu.dimension_semantics<parallel>], iteration_bounds = array<i64: 1>, scalar_prefetch = 0 : i64, scratch_operands = 0 : i64, tpu.core_type = #tpu.core_type<tc>, window_params = [{pipeline_mode = #tpu.pipeline_mode<synchronous>, transform_indices = @transform_0, window_bounds = array<i64: 16, 64>}, {pipeline_mode = #tpu.pipeline_mode<synchronous>, transform_indices = @transform_1, window_bounds = array<i64: 64, 64>}, {pipeline_mode = #tpu.pipeline_mode<synchronous>, transform_indices = @transform_2, window_bounds = array<i64: 1, 64>}, {pipeline_mode = #tpu.pipeline_mode<synchronous>, transform_indices = @transform_3, window_bounds = array<i64: 64, 128>}, {pipeline_mode = #tpu.pipeline_mode<synchronous>, transform_indices = @transform_4, window_bounds = array<i64: 1, 128>}, {pipeline_mode = #tpu.pipeline_mode<synchronous>, transform_indices = @transform_5, window_bounds = array<i64: 16, 64>}, {pipeline_mode = #tpu.pipeline_mode<synchronous>, transform_indices = @transform_6, window_bounds = array<i64: 16, 64>}, {pipeline_mode = #tpu.pipeline_mode<synchronous>, transform_indices = @transform_7, window_bounds = array<i64: 16, 64>}, {pipeline_mode = #tpu.pipeline_mode<synchronous>, transform_indices = @transform_8, window_bounds = array<i64: 64, 64>}, {pipeline_mode = #tpu.pipeline_mode<synchronous>, transform_indices = @transform_9, window_bounds = array<i64: 1, 64>}, {transform_indices = @transform_10, window_bounds = array<i64: 16, 64>}]} {
    %c16_i32 = arith.constant 16 : i32
    %0 = arith.muli %arg0, %c16_i32 : i32
    %1 = tpu.assume_multiple %0, 16 : i32
    %2 = arith.index_cast %1 : i32 to index
    %c0 = arith.constant 0 : index
    %3 = vector.load %arg1[%2, %c0] : memref<16x64xbf16, #tpu.memory_space<vmem>>, vector<16x64xbf16>
    %c0_0 = arith.constant 0 : index
    %c0_1 = arith.constant 0 : index
    %4 = vector.load %arg2[%c0_0, %c0_1] : memref<64x64xbf16, #tpu.memory_space<vmem>>, vector<64x64xbf16>
    %cst = arith.constant dense<0.000000e+00> : vector<16x64xf32>
    %5 = tpu.matmul %3, %4, %cst {dimension_numbers = #tpu.dot_dimension_numbers<[1], [0], [0], [1], [0, 0, 1, 1], [], []>} : vector<16x64xbf16>, vector<64x64xbf16>, vector<16x64xf32> -> vector<16x64xf32>
    %c0_2 = arith.constant 0 : index
    %c0_3 = arith.constant 0 : index
    %6 = vector.load %arg3[%c0_2, %c0_3] : memref<1x64xf32, #tpu.memory_space<vmem>>, vector<1x64xf32>
    %7 = vector.broadcast %6 : vector<1x64xf32> to vector<16x64xf32>
    %8 = arith.addf %5, %7 : vector<16x64xf32>
    %9 = arith.index_cast %1 : i32 to index
    %c0_4 = arith.constant 0 : index
    %10 = vector.load %arg6[%9, %c0_4] : memref<16x64xf32, #tpu.memory_space<vmem>>, vector<16x64xf32>
    %11 = arith.index_cast %1 : i32 to index
    %c0_5 = arith.constant 0 : index
    %12 = vector.load %arg7[%11, %c0_5] : memref<16x64xf32, #tpu.memory_space<vmem>>, vector<16x64xf32>
    %13 = arith.index_cast %1 : i32 to index
    %c0_6 = arith.constant 0 : index
    %14 = vector.load %arg8[%13, %c0_6] : memref<16x64xf32, #tpu.memory_space<vmem>>, vector<16x64xf32>
    %15 = arith.mulf %8, %10 : vector<16x64xf32>
    %16 = vector.extract_strided_slice %8 {offsets = [0, 4], sizes = [16, 60], strides = [1, 1]} : vector<16x64xf32> to vector<16x60xf32>
    %17 = vector.extract_strided_slice %8 {offsets = [0, 0], sizes = [16, 4], strides = [1, 1]} : vector<16x64xf32> to vector<16x4xf32>
    %18 = tpu.concatenate %16, %17 in 1 : vector<16x60xf32>, vector<16x4xf32> -> vector<16x64xf32>
    %19 = arith.mulf %18, %12 : vector<16x64xf32>
    %20 = arith.addf %15, %19 : vector<16x64xf32>
    %21 = vector.extract_strided_slice %8 {offsets = [0, 60], sizes = [16, 4], strides = [1, 1]} : vector<16x64xf32> to vector<16x4xf32>
    %22 = vector.extract_strided_slice %8 {offsets = [0, 0], sizes = [16, 60], strides = [1, 1]} : vector<16x64xf32> to vector<16x60xf32>
    %23 = tpu.concatenate %21, %22 in 1 : vector<16x4xf32>, vector<16x60xf32> -> vector<16x64xf32>
    %24 = arith.mulf %23, %14 : vector<16x64xf32>
    %25 = arith.addf %20, %24 : vector<16x64xf32>
    %26 = arith.truncf %25 : vector<16x64xf32> to vector<16x64xbf16>
    %c0_7 = arith.constant 0 : index
    %c0_8 = arith.constant 0 : index
    %27 = vector.load %arg1[%c0_7, %c0_8] : memref<16x64xbf16, #tpu.memory_space<vmem>>, vector<16x64xbf16>
    %c0_9 = arith.constant 0 : index
    %c0_10 = arith.constant 0 : index
    %28 = vector.load %arg4[%c0_9, %c0_10] : memref<64x128xbf16, #tpu.memory_space<vmem>>, vector<64x128xbf16>
    %cst_11 = arith.constant dense<0.000000e+00> : vector<16x128xf32>
    %29 = tpu.matmul %27, %28, %cst_11 {dimension_numbers = #tpu.dot_dimension_numbers<[1], [0], [0], [1], [0, 0, 1, 1], [], []>} : vector<16x64xbf16>, vector<64x128xbf16>, vector<16x128xf32> -> vector<16x128xf32>
    %c0_12 = arith.constant 0 : index
    %c0_13 = arith.constant 0 : index
    %30 = vector.load %arg5[%c0_12, %c0_13] : memref<1x128xf32, #tpu.memory_space<vmem>>, vector<1x128xf32>
    %31 = vector.broadcast %30 : vector<1x128xf32> to vector<16x128xf32>
    %32 = arith.addf %29, %31 : vector<16x128xf32>
    %33 = vector.extract_strided_slice %32 {offsets = [0, 0], sizes = [16, 64], strides = [1, 1]} : vector<16x128xf32> to vector<16x64xf32>
    %c0_14 = arith.constant 0 : index
    %c0_15 = arith.constant 0 : index
    %34 = vector.load %arg6[%c0_14, %c0_15] : memref<16x64xf32, #tpu.memory_space<vmem>>, vector<16x64xf32>
    %c0_16 = arith.constant 0 : index
    %c0_17 = arith.constant 0 : index
    %35 = vector.load %arg7[%c0_16, %c0_17] : memref<16x64xf32, #tpu.memory_space<vmem>>, vector<16x64xf32>
    %c0_18 = arith.constant 0 : index
    %c0_19 = arith.constant 0 : index
    %36 = vector.load %arg8[%c0_18, %c0_19] : memref<16x64xf32, #tpu.memory_space<vmem>>, vector<16x64xf32>
    %37 = arith.mulf %33, %34 : vector<16x64xf32>
    %38 = vector.extract_strided_slice %33 {offsets = [0, 4], sizes = [16, 60], strides = [1, 1]} : vector<16x64xf32> to vector<16x60xf32>
    %39 = vector.extract_strided_slice %33 {offsets = [0, 0], sizes = [16, 4], strides = [1, 1]} : vector<16x64xf32> to vector<16x4xf32>
    %40 = tpu.concatenate %38, %39 in 1 : vector<16x60xf32>, vector<16x4xf32> -> vector<16x64xf32>
    %41 = arith.mulf %40, %35 : vector<16x64xf32>
    %42 = arith.addf %37, %41 : vector<16x64xf32>
    %43 = vector.extract_strided_slice %33 {offsets = [0, 60], sizes = [16, 4], strides = [1, 1]} : vector<16x64xf32> to vector<16x4xf32>
    %44 = vector.extract_strided_slice %33 {offsets = [0, 0], sizes = [16, 60], strides = [1, 1]} : vector<16x64xf32> to vector<16x60xf32>
    %45 = tpu.concatenate %43, %44 in 1 : vector<16x4xf32>, vector<16x60xf32> -> vector<16x64xf32>
    %46 = arith.mulf %45, %36 : vector<16x64xf32>
    %47 = arith.addf %42, %46 : vector<16x64xf32>
    %48 = arith.truncf %47 : vector<16x64xf32> to vector<16x64xbf16>
    %49 = vector.extract_strided_slice %32 {offsets = [0, 64], sizes = [16, 64], strides = [1, 1]} : vector<16x128xf32> to vector<16x64xf32>
    %50 = arith.truncf %49 : vector<16x64xf32> to vector<16x64xbf16>
    %51 = vector.extract_strided_slice %26 {offsets = [0, 0], sizes = [16, 16], strides = [1, 1]} : vector<16x64xbf16> to vector<16x16xbf16>
    %52 = vector.extract_strided_slice %26 {offsets = [0, 16], sizes = [16, 16], strides = [1, 1]} : vector<16x64xbf16> to vector<16x16xbf16>
    %53 = vector.extract_strided_slice %26 {offsets = [0, 32], sizes = [16, 16], strides = [1, 1]} : vector<16x64xbf16> to vector<16x16xbf16>
    %54 = vector.extract_strided_slice %26 {offsets = [0, 48], sizes = [16, 16], strides = [1, 1]} : vector<16x64xbf16> to vector<16x16xbf16>
    %55 = vector.shape_cast %51 : vector<16x16xbf16> to vector<1x16x16xbf16>
    %56 = vector.shape_cast %52 : vector<16x16xbf16> to vector<1x16x16xbf16>
    %57 = vector.shape_cast %53 : vector<16x16xbf16> to vector<1x16x16xbf16>
    %58 = vector.shape_cast %54 : vector<16x16xbf16> to vector<1x16x16xbf16>
    %59 = tpu.concatenate %55, %56, %57, %58 in 0 : vector<1x16x16xbf16>, vector<1x16x16xbf16>, vector<1x16x16xbf16>, vector<1x16x16xbf16> -> vector<4x16x16xbf16>
    %60 = vector.extract_strided_slice %48 {offsets = [0, 0], sizes = [16, 16], strides = [1, 1]} : vector<16x64xbf16> to vector<16x16xbf16>
    %61 = vector.extract_strided_slice %48 {offsets = [0, 16], sizes = [16, 16], strides = [1, 1]} : vector<16x64xbf16> to vector<16x16xbf16>
    %62 = vector.extract_strided_slice %48 {offsets = [0, 32], sizes = [16, 16], strides = [1, 1]} : vector<16x64xbf16> to vector<16x16xbf16>
    %63 = vector.extract_strided_slice %48 {offsets = [0, 48], sizes = [16, 16], strides = [1, 1]} : vector<16x64xbf16> to vector<16x16xbf16>
    %64 = vector.shape_cast %60 : vector<16x16xbf16> to vector<1x16x16xbf16>
    %65 = vector.shape_cast %61 : vector<16x16xbf16> to vector<1x16x16xbf16>
    %66 = vector.shape_cast %62 : vector<16x16xbf16> to vector<1x16x16xbf16>
    %67 = vector.shape_cast %63 : vector<16x16xbf16> to vector<1x16x16xbf16>
    %68 = tpu.concatenate %64, %65, %66, %67 in 0 : vector<1x16x16xbf16>, vector<1x16x16xbf16>, vector<1x16x16xbf16>, vector<1x16x16xbf16> -> vector<4x16x16xbf16>
    %69 = vector.extract_strided_slice %50 {offsets = [0, 0], sizes = [16, 16], strides = [1, 1]} : vector<16x64xbf16> to vector<16x16xbf16>
    %70 = vector.extract_strided_slice %50 {offsets = [0, 16], sizes = [16, 16], strides = [1, 1]} : vector<16x64xbf16> to vector<16x16xbf16>
    %71 = vector.extract_strided_slice %50 {offsets = [0, 32], sizes = [16, 16], strides = [1, 1]} : vector<16x64xbf16> to vector<16x16xbf16>
    %72 = vector.extract_strided_slice %50 {offsets = [0, 48], sizes = [16, 16], strides = [1, 1]} : vector<16x64xbf16> to vector<16x16xbf16>
    %73 = vector.shape_cast %69 : vector<16x16xbf16> to vector<1x16x16xbf16>
    %74 = vector.shape_cast %70 : vector<16x16xbf16> to vector<1x16x16xbf16>
    %75 = vector.shape_cast %71 : vector<16x16xbf16> to vector<1x16x16xbf16>
    %76 = vector.shape_cast %72 : vector<16x16xbf16> to vector<1x16x16xbf16>
    %77 = tpu.concatenate %73, %74, %75, %76 in 0 : vector<1x16x16xbf16>, vector<1x16x16xbf16>, vector<1x16x16xbf16>, vector<1x16x16xbf16> -> vector<4x16x16xbf16>
    "tpu.trace_start"() <{level = 10 : i32, message = "nqd,nkd->nqk"}> : () -> ()
    %cst_20 = arith.constant dense<0.000000e+00> : vector<4x16x16xf32>
    %78 = tpu.matmul %59, %68, %cst_20 {dimension_numbers = #tpu.dot_dimension_numbers<[2], [2], [1], [1], [0, 0, 0, 1, 1, 1], [0], [0]>} : vector<4x16x16xbf16>, vector<4x16x16xbf16>, vector<4x16x16xf32> -> vector<4x16x16xf32>
    "tpu.trace_stop"() : () -> ()
    %c16_i32_21 = arith.constant 16 : i32
    %79 = arith.muli %arg0, %c16_i32_21 : i32
    %80 = tpu.iota {dimensions = array<i32: 0>} : vector<16x16xi32>
    %81 = vector.broadcast %79 : i32 to vector<16x16xi32>
    %82 = arith.addi %81, %80 : vector<16x16xi32>
    %83 = tpu.iota {dimensions = array<i32: 1>} : vector<16x16xi32>
    %84 = arith.cmpi sge, %82, %83 : vector<16x16xi32>
    %85 = vector.shape_cast %84 : vector<16x16xi1> to vector<1x16x16xi1>
    %cst_22 = arith.constant -1.000000e+30 : f32
    %86 = vector.shape_cast %85 : vector<1x16x16xi1> to vector<1x16x16xi1>
    %87 = vector.broadcast %86 : vector<1x16x16xi1> to vector<4x16x16xi1>
    %88 = vector.broadcast %cst_22 : f32 to vector<4x16x16xf32>
    %89 = arith.select %87, %78, %88 : vector<4x16x16xi1>, vector<4x16x16xf32>
    %cst_23 = arith.constant dense<0xFF800000> : vector<4x16xf32>
    %90 = vector.multi_reduction <maximumf>, %89, %cst_23 [2] : vector<4x16x16xf32> to vector<4x16xf32>
    %91 = vector.shape_cast %90 : vector<4x16xf32> to vector<4x16x1xf32>
    %92 = vector.broadcast %91 : vector<4x16x1xf32> to vector<4x16x16xf32>
    %93 = arith.subf %89, %92 : vector<4x16x16xf32>
    %94 = math.exp %93 : vector<4x16x16xf32>
    %cst_24 = arith.constant dense<0.000000e+00> : vector<4x16xf32>
    %95 = vector.multi_reduction <add>, %94, %cst_24 [2] : vector<4x16x16xf32> to vector<4x16xf32>
    %96 = vector.shape_cast %95 : vector<4x16xf32> to vector<4x16x1xf32>
    %97 = arith.truncf %94 : vector<4x16x16xf32> to vector<4x16x16xbf16>
    "tpu.trace_start"() <{level = 10 : i32, message = "nqk,nkd->nqd"}> : () -> ()
    %cst_25 = arith.constant dense<0.000000e+00> : vector<4x16x16xf32>
    %98 = tpu.matmul %97, %77, %cst_25 {dimension_numbers = #tpu.dot_dimension_numbers<[2], [1], [1], [2], [0, 0, 0, 1, 1, 2], [0], [0]>} : vector<4x16x16xbf16>, vector<4x16x16xbf16>, vector<4x16x16xf32> -> vector<4x16x16xf32>
    "tpu.trace_stop"() : () -> ()
    %99 = tpu.reciprocal %96 {approx = true} : vector<4x16x1xf32> -> vector<4x16x1xf32>
    %100 = vector.broadcast %99 : vector<4x16x1xf32> to vector<4x16x16xf32>
    %101 = arith.mulf %98, %100 : vector<4x16x16xf32>
    %102 = vector.extract_strided_slice %101 {offsets = [0, 0, 0], sizes = [1, 16, 16], strides = [1, 1, 1]} : vector<4x16x16xf32> to vector<1x16x16xf32>
    %103 = vector.shape_cast %102 : vector<1x16x16xf32> to vector<16x16xf32>
    %104 = vector.extract_strided_slice %101 {offsets = [1, 0, 0], sizes = [1, 16, 16], strides = [1, 1, 1]} : vector<4x16x16xf32> to vector<1x16x16xf32>
    %105 = vector.shape_cast %104 : vector<1x16x16xf32> to vector<16x16xf32>
    %106 = vector.extract_strided_slice %101 {offsets = [2, 0, 0], sizes = [1, 16, 16], strides = [1, 1, 1]} : vector<4x16x16xf32> to vector<1x16x16xf32>
    %107 = vector.shape_cast %106 : vector<1x16x16xf32> to vector<16x16xf32>
    %108 = vector.extract_strided_slice %101 {offsets = [3, 0, 0], sizes = [1, 16, 16], strides = [1, 1, 1]} : vector<4x16x16xf32> to vector<1x16x16xf32>
    %109 = vector.shape_cast %108 : vector<1x16x16xf32> to vector<16x16xf32>
    %110 = tpu.concatenate %103, %105, %107, %109 in 1 : vector<16x16xf32>, vector<16x16xf32>, vector<16x16xf32>, vector<16x16xf32> -> vector<16x64xf32>
    %111 = arith.truncf %110 : vector<16x64xf32> to vector<16x64xbf16>
    %c0_26 = arith.constant 0 : index
    %c0_27 = arith.constant 0 : index
    %112 = vector.load %arg9[%c0_26, %c0_27] : memref<64x64xbf16, #tpu.memory_space<vmem>>, vector<64x64xbf16>
    %cst_28 = arith.constant dense<0.000000e+00> : vector<16x64xf32>
    %113 = tpu.matmul %111, %112, %cst_28 {dimension_numbers = #tpu.dot_dimension_numbers<[1], [0], [0], [1], [0, 0, 1, 1], [], []>} : vector<16x64xbf16>, vector<64x64xbf16>, vector<16x64xf32> -> vector<16x64xf32>
    %c0_29 = arith.constant 0 : index
    %c0_30 = arith.constant 0 : index
    %114 = vector.load %arg10[%c0_29, %c0_30] : memref<1x64xf32, #tpu.memory_space<vmem>>, vector<1x64xf32>
    %115 = vector.broadcast %114 : vector<1x64xf32> to vector<16x64xf32>
    %116 = arith.addf %113, %115 : vector<16x64xf32>
    %c0_31 = arith.constant 0 : index
    %c0_32 = arith.constant 0 : index
    %117 = vector.load %arg11[%c0_31, %c0_32] : memref<16x64xf32, #tpu.memory_space<vmem>>, vector<16x64xf32>
    tpu.vector_store %arg11[%c0_31, %c0_32], %116 {strides = array<i32>} : memref<16x64xf32, #tpu.memory_space<vmem>>, vector<16x64xf32>,
    return
  }
  func.func @transform_0(%arg0: i32) -> (i32, i32) {
    %c0_i32 = arith.constant 0 : i32
    %c0_i32_0 = arith.constant 0 : i32
    %c0_i32_1 = arith.constant 0 : i32
    return %c0_i32, %c0_i32_0 : i32, i32
  }
  func.func @transform_1(%arg0: i32) -> (i32, i32) {
    %c0_i32 = arith.constant 0 : i32
    %c0_i32_0 = arith.constant 0 : i32
    %c0_i32_1 = arith.constant 0 : i32
    return %c0_i32, %c0_i32_0 : i32, i32
  }
  func.func @transform_2(%arg0: i32) -> (i32, i32) {
    %c0_i32 = arith.constant 0 : i32
    %c0_i32_0 = arith.constant 0 : i32
    %c0_i32_1 = arith.constant 0 : i32
    return %c0_i32, %c0_i32_0 : i32, i32
  }
  func.func @transform_3(%arg0: i32) -> (i32, i32) {
    %c0_i32 = arith.constant 0 : i32
    %c0_i32_0 = arith.constant 0 : i32
    %c0_i32_1 = arith.constant 0 : i32
    return %c0_i32, %c0_i32_0 : i32, i32
  }
  func.func @transform_4(%arg0: i32) -> (i32, i32) {
    %c0_i32 = arith.constant 0 : i32
    %c0_i32_0 = arith.constant 0 : i32
    %c0_i32_1 = arith.constant 0 : i32
    return %c0_i32, %c0_i32_0 : i32, i32
  }
  func.func @transform_5(%arg0: i32) -> (i32, i32) {
    %c0_i32 = arith.constant 0 : i32
    %c0_i32_0 = arith.constant 0 : i32
    %c0_i32_1 = arith.constant 0 : i32
    return %c0_i32, %c0_i32_0 : i32, i32
  }
  func.func @transform_6(%arg0: i32) -> (i32, i32) {
    %c0_i32 = arith.constant 0 : i32
    %c0_i32_0 = arith.constant 0 : i32
    %c0_i32_1 = arith.constant 0 : i32
    return %c0_i32, %c0_i32_0 : i32, i32
  }
  func.func @transform_7(%arg0: i32) -> (i32, i32) {
    %c0_i32 = arith.constant 0 : i32
    %c0_i32_0 = arith.constant 0 : i32
    %c0_i32_1 = arith.constant 0 : i32
    return %c0_i32, %c0_i32_0 : i32, i32
  }
  func.func @transform_8(%arg0: i32) -> (i32, i32) {
    %c0_i32 = arith.constant 0 : i32
    %c0_i32_0 = arith.constant 0 : i32
    %c0_i32_1 = arith.constant 0 : i32
    return %c0_i32, %c0_i32_0 : i32, i32
  }
  func.func @transform_9(%arg0: i32) -> (i32, i32) {
    %c0_i32 = arith.constant 0 : i32
    %c0_i32_0 = arith.constant 0 : i32
    %c0_i32_1 = arith.constant 0 : i32
    return %c0_i32, %c0_i32_0 : i32, i32
  }
  func.func @transform_10(%arg0: i32) -> (i32, i32) {
    %c0_i32 = arith.constant 0 : i32
    %c0_i32_0 = arith.constant 0 : i32
    return %arg0, %c0_i32 : i32, i32
  }
}

</mosaic_0001>

<bundles_post_ra>
// kernel: tpu_custom_call.1
= control target key start
LH: loop header
LB: loop body
LE: loop exit
PB: predicated region body
PF: predicated region fallthrough
CT: control target
= control target key end

     0   :  { %15 = vsyncpa [#allocation3], 0  ;;  %s1471_s0 = inlined_call_operand.hbm [shape: bf16[16,64], index: 0, kind: input, shape index: {}]   ;;  %s1472_s1 = inlined_call_operand.hbm [shape: bf16[64,64], index: 1, kind: input, shape index: {}]   ;;  %s1473_s2 = inlined_call_operand.vmem [shape: f32[1,64], index: 2, kind: input, shape index: {}]   ;;  %s1474_s3 = inlined_call_operand.hbm [shape: bf16[64,128], index: 3, kind: input, shape index: {}]   ;;  %s1475_s4 = inlined_call_operand.vmem [shape: f32[1,128], index: 4, kind: input, shape index: {}]   ;;  %s1476_s5 = inlined_call_operand.hbm [shape: f32[16,64], index: 5, kind: input, shape index: {}]   ;;  %s1477_s6 = inlined_call_operand.hbm [shape: f32[16,64], index: 6, kind: input, shape index: {}]   ;;  %s1478_s7 = inlined_call_operand.hbm [shape: f32[16,64], index: 7, kind: input, shape index: {}]   ;;  %s1479_s8 = inlined_call_operand.hbm [shape: bf16[64,64], index: 8, kind: input, shape index: {}]   ;;  %s1480_s9 = inlined_call_operand.vmem [shape: f32[1,64], index: 9, kind: input, shape index: {}]   ;;  %s1481_s10 = inlined_call_operand.hbm [shape: f32[16,64], index: 10, kind: output, shape index: {}]  }
   0x1   :  { %16 = vsyncpa [#allocation6], 0 }
   0x2   :  { %17 = vsyncpa [#allocation9], 0 }
   0x3   :  { %18 = vsyncpa [#allocation12], 0 }
   0x4   :  { %19 = vsyncpa [#allocation4], 0  ;;  %s37_s15 = sshll.u32 %s1472_s1, 4  ;;  %s1218_s16 = smov [#allocation5]   ;;  %s38_s15 = int_to_ptr.hbm [resolvable:$true] %s37_s15 }
   0x5   :  { %s39_s17 = sshll.u32 %s1218_s16, 4  ;;  %s67_s20 = sshll.u32 %s1476_s5, 4  ;;  %s40_s17 = int_to_ptr.vmem [resolvable:$true] %s39_s17  ;;  %s68_s20 = int_to_ptr.hbm [resolvable:$true] %s67_s20 }
   0x6   :  { %s1219_s21 = smov 64   ;;  %s1220_s22 = smov 4  }
   0x7   :  { %45 = dma.hbm_to_vmem [thread:$0]  %s38_s15, 512, %s40_s17, [#allocation6], %s1219_s21, %s1219_s21, %s1220_s22  }
   0x8   :  { %s1221_s23 = smov [#allocation8]   ;;  %s1222_s25 = smov 128  }
   0x9   :  { %s69_s24 = sshll.u32 %s1221_s23, 4  ;;  %s1223_s1 = smov 8   ;;  %s70_s24 = int_to_ptr.vmem [resolvable:$true] %s69_s24 }
   0xa   :  { %75 = dma.hbm_to_vmem [thread:$0]  %s68_s20, 256, %s70_s24, [#allocation9], %s1222_s25, %s1222_s25, %s1223_s1  }
   0xb   :  { %s93_s5 = sshll.u32 %s1478_s7, 4  ;;  %s1224_s28 = smov [#allocation11]   ;;  %s94_s5 = int_to_ptr.hbm [resolvable:$true] %s93_s5 }
   0xc   :  { %s95_s29 = sshll.u32 %s1224_s28, 4  ;;  %s24_s12 = sshll.u32 %s1471_s0, 4  ;;  %s96_s29 = int_to_ptr.vmem [resolvable:$true] %s95_s29  ;;  %s25_s12 = int_to_ptr.hbm [resolvable:$true] %s24_s12 }
   0xd   :  { %101 = dma.hbm_to_vmem [thread:$0]  %s94_s5, 256, %s96_s29, [#allocation12], %s1222_s25, %s1222_s25, %s1223_s1  }
   0xe   :  { %s1225_s13 = smov [#allocation2]   ;;  %s52_s17 = sshll.u32 %s1474_s3, 4  ;;  %s53_s17 = int_to_ptr.hbm [resolvable:$true] %s52_s17 }
   0xf   :  { %s26_s14 = sshll.u32 %s1225_s13, 4  ;;  %s80_s0 = sshll.u32 %s1477_s6, 4  ;;  %s27_s14 = int_to_ptr.vmem [resolvable:$true] %s26_s14  ;;  %s81_s0 = int_to_ptr.hbm [resolvable:$true] %s80_s0 }
  0x10   :  { %32 = dma.hbm_to_vmem [thread:$0]  %s25_s12, 128, %s27_s14, [#allocation3], %s1219_s21, %s1219_s21, %s1220_s22  }
  0x11   :  { %s1226_s19 = smov [#allocation7]   ;;  %s1227_s23 = smov [#allocation10]  }
  0x12   :  { %s54_s20 = sshll.u32 %s1226_s19, 4  ;;  %s82_s3 = sshll.u32 %s1227_s23, 4  ;;  %s55_s20 = int_to_ptr.vmem [resolvable:$true] %s54_s20  ;;  %s83_s3 = int_to_ptr.vmem [resolvable:$true] %s82_s3 }
  0x13   :  { %60 = dma.hbm_to_vmem [thread:$0]  %s53_s17, 512, %s55_s20, [#allocation6], %s1219_s21, %s1219_s21, %s1220_s22  }
  0x14   :  { %s106_s27 = sshll.u32 %s1479_s8, 4  ;;  %s1228_s6 = smov [#allocation13]   ;;  %s107_s27 = int_to_ptr.hbm [resolvable:$true] %s106_s27 }
  0x15   :  { %88 = dma.hbm_to_vmem [thread:$0]  %s81_s0, 256, %s83_s3, [#allocation9], %s1222_s25, %s1222_s25, %s1223_s1  }
  0x16   :  { %s108_s5 = sshll.u32 %s1228_s6, 4  ;;  %s109_s5 = int_to_ptr.vmem [resolvable:$true] %s108_s5 }
  0x17   :  { %114 = dma.hbm_to_vmem [thread:$0]  %s107_s27, 512, %s109_s5, [#allocation12], %s1219_s21, %s1219_s21, %s1220_s22  }
  0x18   :  { %1208 = dma.done.wait [#allocation3], 128  }
  0x19   :  { %1209 = vsyncadd [#allocation3], 4294967168 }
  0x1a   :  { %1210 = dma.done.wait [#allocation6], 1024  }
  0x1b   :  { %1211 = vsyncadd [#allocation6], 4294966272 }
  0x1c   :  { %1212 = dma.done.wait [#allocation9], 512  }
  0x1d   :  { %1213 = vsyncadd [#allocation9], 4294966784 }
  0x1e   :  { %1214 = dma.done.wait [#allocation12], 768  }
  0x1f   :  { %1215 = vsyncadd [#allocation12], 4294966528  ;;  %v940_v0 = vld [vmem:[#allocation7 + $0x18] sm:$0xff]  ;;  %v939_v2 = vld [vmem:[#allocation7 + $0x10] sm:$0xff]  ;;  %vm194_vm0 = vcmask 523264   ;;  %s1229_s29 = smov 68  }
  0x20   :  { %v935_v1 = vld [vmem:[#allocation5 + $0x18] sm:$0xff]  ;;  %315 = vmatpush.bf16.msra.mxu1 %v940_v0  ;;  %v934_v3 = vld [vmem:[#allocation5 + $0x10] sm:$0xff]  ;;  %v938_v4 = vld [vmem:[#allocation7 + $0x8] sm:$0xff]  ;;  %s1230_s30 = smov 60   ;;  %s1231_s13 = smov 124   ;;  %vm237_vm1 = vcmask 490496  }
  0x21   :  { %202 = vmatpush.bf16.msra.mxu0 %v935_v1  ;;  %v933_v5 = vld [vmem:[#allocation5 + $0x8] sm:$0xff]  ;;  %v937_v6 = vld [vmem:[#allocation7] sm:$0xff]  ;;  %v936_v8 = vld [vmem:[#allocation2] sm:$0xff]  ;;  %vm256_vm2 = vcmask 31744   ;;  %vm423_vm3 = vcmask 130048   ;;  %s1236_s14 = smov 16  }
  0x22   :  { %v932_v7 = vld [vmem:[#allocation5] sm:$0xff]  ;;  %v931_v9 = vld [vmem:[#allocation2] sm:$0xff]  ;;  %v327_v25 = vld [vmem:[#allocation10] sm:$0xff]  ;;  %s1237_s15 = smov 48   ;;  %vm778_vm6 = vcmask 261120   ;;  %vm781_vm7 = vcmask 392192  }
  0x23   :  { %v981_v10 = vld [vmem:[%s1475_s4] ss:$0 sm:$0xff]  ;;  %v325_v27 = vld [vmem:[#allocation8] sm:$0xff]  ;;  %v326_v50 = vld [vmem:[#allocation8 + $0x8] sm:$0xff]  ;;  %s1233_s4 = smov 96   ;;  %s1238_s7 = smov [#allocation14]  }
  0x24   :  { %316 = vmatpush.bf16.msra.mxu1 %v939_v2  ;;  %v982_v13 = vld [vmem:[%s1473_s2] ss:$0 sm:$0xff]  ;;  %v329_v30 = vld [vmem:[#allocation11] sm:$0xff]  ;;  %s1232_s2 = smov 112   ;;  %v330_v55 = vld [vmem:[#allocation11 + $0x8] sm:$0xff]  ;;  %s844_s18 = sshll.u32 %s1238_s7, 4  ;;  %s845_s18 = int_to_ptr.vmem [resolvable:$true] %s844_s18 }
  0x25   :  { %203 = vmatpush.bf16.msra.mxu0 %v934_v3  ;;  %v328_v51 = vld [vmem:[#allocation10 + $0x8] sm:$0xff]  ;;  %s846_s20 = sshll.u32 %s1481_s10, 4  ;;  %s847_s20 = int_to_ptr.hbm [resolvable:$true] %s846_s20 }
  0x28   :  { %317 = vmatpush.bf16.msra.mxu1 %v938_v4 }
  0x29   :  { %204 = vmatpush.bf16.msra.mxu0 %v933_v5 }
  0x2c   :  { %318 = vmatpush.bf16.msra.mxu1 %v937_v6 }
  0x2d   :  { %205 = vmatpush.bf16.msra.mxu0 %v932_v7 }
  0x2f   :  { %905 = vmatmul.msk.bf16.vlgmr.msra.gmra.mxu1 %vm194_vm0, %v936_v8 }
  0x30   :  { %884 = vmatmul.msk.bf16.vlgmr.msra.gmra.mxu0 %vm194_vm0, %v931_v9 }
  0xac   :  { %v320_v11 = vpop.f32.mrf.mxu1 }
  0xad   :  { %v1341_v12 = vadd.f32 %v981_v10, %v320_v11  ;;  %v207_v14 = vpop.f32.mrf.mxu0 }
  0xae   :  { %v208_v15 = vadd.f32 %v982_v13, %v207_v14 }
  0xaf   :  { %353 = vrot.lane.b32.xlu2 %v1341_v12, %s1229_s29  ;;  %341 = vrot.lane.b32.xlu1 %v1341_v12, %s1230_s30  ;;  %v331_v32 = vmul.f32 %v325_v27, %v1341_v12 }
  0xb0   :  { %335 = vrot.lane.b32.xlu0 %v1341_v12, %s1231_s13  ;;  %v221_v42 = vmul.f32 %v325_v27, %v208_v15 }
  0xb4   :  { %v322_v16 = vpop.f32.mrf.mxu1 }
  0xb5   :  { %v1351_v17 = vadd.f32 %v981_v10, %v322_v16  ;;  %v209_v18 = vpop.f32.mrf.mxu0 }
  0xb6   :  { %v1355_v19 = vadd.f32 %v982_v13, %v209_v18 }
  0xb7   :  { %231 = vrot.lane.b32.xlu1 %v208_v15, %s1230_s30  ;;  %225 = vrot.lane.b32.xlu2 %v208_v15, %s1231_s13  ;;  %v332_v57 = vmul.f32 %v326_v50, %v1351_v17 }
  0xb8   :  { %359 = vrot.lane.b32.xlu0 %v1341_v12, %s1220_s22  ;;  %v222_v6 = vmul.f32 %v326_v50, %v1355_v19 }
  0xbf   :  { %343 = vrot.lane.b32.xlu1 %v1351_v17, %s1230_s30  ;;  %355 = vrot.lane.b32.xlu2 %v1351_v17, %s1229_s29 }
  0xc0   :  { %244 = vrot.lane.b32.xlu0 %v208_v15, %s1229_s29 }
  0xc7   :  { %361 = vrot.lane.b32.xlu1 %v1351_v17, %s1220_s22  ;;  %233 = vrot.lane.b32.xlu2 %v1355_v19, %s1230_s30 }
  0xc8   :  { %337 = vrot.lane.b32.xlu0 %v1351_v17, %s1231_s13 }
  0xcf   :  { %246 = vrot.lane.b32.xlu1 %v1355_v19, %s1229_s29  ;;  %250 = vrot.lane.b32.xlu2 %v208_v15, %s1220_s22 }
  0xd0   :  { %227 = vrot.lane.b32.xlu0 %v1355_v19, %s1231_s13 }
  0xd8   :  { %252 = vrot.lane.b32.xlu0 %v1355_v19, %s1220_s22  ;;  %s1234_s22 = smov 80   ;;  %v1388_v19 = vpack.c.bf16 %v1341_v12, %v1341_v12 }
 0x109   :  { %v354_v20 = vpop.permute.xlu2 %353 }
 0x111   :  { %v226_v21 = vpop.permute.xlu2 %225 }
 0x119   :  { %v356_v22 = vpop.permute.xlu2 %355 }
 0x121   :  { %v342_v23 = vpop.permute.xlu1 %341  ;;  %v234_v29 = vpop.permute.xlu2 %233 }
 0x122   :  { %v336_v24 = vpop.permute.xlu0 %335 }
 0x123   :  { %v347_v26 = vsel %vm237_vm1, %v336_v24, %v342_v23 }
 0x124   :  { %v349_v28 = vmul.f32 %v347_v26, %v327_v25 }
 0x126   :  { %v351_v35 = vadd.f32 %v349_v28, %v331_v32 }
 0x129   :  { %v232_v31 = vpop.permute.xlu1 %231  ;;  %v251_v43 = vpop.permute.xlu2 %250 }
 0x12a   :  { %v360_v33 = vpop.permute.xlu0 %359  ;;  %v238_v37 = vsel %vm237_vm1, %v226_v21, %v232_v31 }
 0x12b   :  { %v365_v34 = vsel %vm256_vm2, %v354_v20, %v360_v33  ;;  %v240_v40 = vmul.f32 %v327_v25, %v238_v37  ;;  %v1394_v20 = vpack.c.bf16 %v1351_v17, %v1351_v17 }
 0x12c   :  { %v367_v36 = vmul.f32 %v365_v34, %v329_v30 }
 0x12d   :  { %v242_v46 = vadd.f32 %v240_v40, %v221_v42 }
 0x12e   :  { %v369_v38 = vadd.f32 %v367_v36, %v351_v35 }
 0x130   :  { %v371_v39 = vpack.c.bf16 %v369_v38, %v369_v38 }
 0x131   :  { %v344_v41 = vpop.permute.xlu1 %343 }
 0x132   :  { %v245_v44 = vpop.permute.xlu0 %244  ;;  %391 = vrot.lane.b32.xlu1 %v371_v39, %s1232_s2  ;;  %v420_v0 = vunpack.c.l.b16 %v371_v39 }
 0x133   :  { %v257_v45 = vsel %vm256_vm2, %v245_v44, %v251_v43 }
 0x134   :  { %v259_v47 = vmul.f32 %v329_v30, %v257_v45 }
 0x136   :  { %v261_v48 = vadd.f32 %v259_v47, %v242_v46 }
 0x138   :  { %v263_v49 = vpack.c.bf16 %v261_v48, %v261_v48 }
 0x139   :  { %v362_v52 = vpop.permute.xlu1 %361 }
 0x13a   :  { %v338_v53 = vpop.permute.xlu0 %337  ;;  %377 = vrot.lane.b32.xlu0 %v263_v49, %s1232_s2  ;;  %v366_v56 = vsel %vm256_vm2, %v356_v22, %v362_v52  ;;  %v417_v15 = vunpack.c.l.b16 %v263_v49 }
 0x13b   :  { %v348_v54 = vsel %vm237_vm1, %v338_v53, %v344_v41  ;;  %v368_v60 = vmul.f32 %v366_v56, %v330_v55 }
 0x13c   :  { %v350_v58 = vmul.f32 %v348_v54, %v328_v51  ;;  %v522_v54 = vlaneseq }
 0x13e   :  { %v352_v59 = vadd.f32 %v350_v58, %v332_v57  ;;  %v523_v57 = vshrl.u32 %v522_v54, 7  ;;  %v529_v58 = vand.u32 127, %v522_v54 }
 0x140   :  { %v370_v61 = vadd.f32 %v368_v60, %v352_v59  ;;  %vm530_vm4 = vcmp.ge.s32.totalorder %v523_v57, %v529_v58 }
 0x141   :  { %v247_v7 = vpop.permute.xlu1 %246 }
 0x142   :  { %v372_v62 = vpack.c.bf16 %v370_v61, %v370_v61  ;;  %v228_v63 = vpop.permute.xlu0 %227 }
 0x143   :  { %v239_v2 = vsel %vm237_vm1, %v228_v63, %v234_v29 }
 0x144   :  { %393 = vrot.lane.b32.xlu2 %v372_v62, %s1232_s2  ;;  %397 = vrot.lane.b32.xlu0 %v372_v62, %s1233_s4  ;;  %v421_v1 = vunpack.c.l.b16 %v372_v62  ;;  %v241_v4 = vmul.f32 %v328_v51, %v239_v2 }
 0x146   :  { %v422_v3 = vpack.c.b16 %v421_v1, %v420_v0  ;;  %v243_v10 = vadd.f32 %v241_v4, %v222_v6  ;;  %v524_v1 = vadd.s32 8, %v523_v57 }
 0x148   :  { %v428_v5 = vsel %vm423_vm3, %v422_v3, 0  ;;  %vm531_vm5 = vcmp.ge.s32.totalorder %v524_v1, %v529_v58 }
 0x149   :  { %437 = vmatpush.bf16.xpose.msra.mxu2 %v428_v5 }
 0x14a   :  { %v253_v8 = vpop.permute.xlu0 %252 }
 0x14b   :  { %v258_v9 = vsel %vm256_vm2, %v247_v7, %v253_v8 }
 0x14c   :  { %v260_v11 = vmul.f32 %v330_v55, %v258_v9  ;;  %395 = vrot.lane.b32.xlu2 %v371_v39, %s1233_s4  ;;  %381 = vrot.lane.b32.xlu0 %v263_v49, %s1233_s4 }
 0x14e   :  { %v262_v13 = vadd.f32 %v260_v11, %v243_v10 }
 0x150   :  { %v264_v14 = vpack.c.bf16 %v262_v13, %v262_v13 }
 0x152   :  { %379 = vrot.lane.b32.xlu1 %v264_v14, %s1232_s2  ;;  %v418_v16 = vunpack.c.l.b16 %v264_v14 }
 0x154   :  { %401 = vrot.lane.b32.xlu2 %v372_v62, %s1234_s22  ;;  %387 = vrot.lane.b32.xlu0 %v264_v14, %s1234_s22  ;;  %v419_v18 = vpack.c.b16 %v418_v16, %v417_v15 }
 0x156   :  { %906 = vmatmul.msk.bf16.vlgmr.msra.gmra.mxu2 %vm423_vm3, %v419_v18 }
 0x15a   :  { %399 = vrot.lane.b32.xlu1 %v371_v39, %s1234_s22 }
 0x15c   :  { %385 = vrot.lane.b32.xlu2 %v263_v49, %s1234_s22  ;;  %413 = vrot.lane.b32.xlu0 %v1388_v19, %s1234_s22 }
 0x162   :  { %383 = vrot.lane.b32.xlu1 %v264_v14, %s1233_s4 }
 0x164   :  { %411 = vrot.lane.b32.xlu2 %v1394_v20, %s1233_s4  ;;  %407 = vrot.lane.b32.xlu0 %v1394_v20, %s1232_s2 }
 0x16a   :  { %409 = vrot.lane.b32.xlu1 %v1388_v19, %s1233_s4 }
 0x16c   :  { %405 = vrot.lane.b32.xlu2 %v1388_v19, %s1232_s2 }
 0x172   :  { %415 = vrot.lane.b32.xlu1 %v1394_v20, %s1234_s22 }
 0x19e   :  { %v394_v12 = vpop.permute.xlu2 %393 }
 0x19f   :  { %v448_v22 = vunpack.c.l.b16 %v394_v12 }
 0x1a4   :  { %v392_v21 = vpop.permute.xlu1 %391 }
 0x1a5   :  { %v447_v23 = vunpack.c.l.b16 %v392_v21 }
 0x1a6   :  { %v396_v26 = vpop.permute.xlu2 %395 }
 0x1a7   :  { %v449_v17 = vpack.c.b16 %v448_v22, %v447_v23  ;;  %v473_v28 = vunpack.c.l.b16 %v396_v26 }
 0x1a9   :  { %v454_v24 = vsel %vm423_vm3, %v449_v17, 0 }
 0x1aa   :  { %463 = vmatpush.bf16.xpose.msra.mxu3 %v454_v24 }
 0x1ac   :  { %v378_v25 = vpop.permute.xlu0 %377 }
 0x1ad   :  { %v444_v33 = vunpack.c.l.b16 %v378_v25 }
 0x1ae   :  { %v402_v37 = vpop.permute.xlu2 %401 }
 0x1af   :  { %v500_v39 = vunpack.c.l.b16 %v402_v37 }
 0x1b6   :  { %v398_v27 = vpop.permute.xlu0 %397  ;;  %v386_v44 = vpop.permute.xlu2 %385 }
 0x1b7   :  { %v474_v29 = vunpack.c.l.b16 %v398_v27  ;;  %v496_v47 = vunpack.c.l.b16 %v386_v44 }
 0x1b9   :  { %v475_v30 = vpack.c.b16 %v474_v29, %v473_v28  ;;  %v630_v29 = vunpack.c.l.b16 %v1394_v20 }
 0x1bb   :  { %v480_v31 = vsel %vm423_vm3, %v475_v30, 0  ;;  %v629_v30 = vunpack.c.l.b16 %v1388_v19 }
 0x1bc   :  { %489 = vmatpush.bf16.xpose.msrb.mxu2 %v480_v31 }
 0x1bd   :  { %v631_v31 = vpack.c.b16 %v630_v29, %v629_v30 }
 0x1be   :  { %v382_v35 = vpop.permute.xlu0 %381  ;;  %v412_v9 = vpop.permute.xlu2 %411 }
 0x1bf   :  { %v470_v48 = vunpack.c.l.b16 %v382_v35  ;;  %v686_v13 = vunpack.c.l.b16 %v412_v9 }
 0x1c4   :  { %v380_v32 = vpop.permute.xlu1 %379 }
 0x1c5   :  { %v445_v34 = vunpack.c.l.b16 %v380_v32 }
 0x1c6   :  { %v388_v42 = vpop.permute.xlu0 %387  ;;  %v406_v25 = vpop.permute.xlu2 %405 }
 0x1c7   :  { %v446_v36 = vpack.c.b16 %v445_v34, %v444_v33  ;;  %v497_v45 = vunpack.c.l.b16 %v388_v42  ;;  %v657_v27 = vunpack.c.l.b16 %v406_v25 }
 0x1c9   :  { %907 = vmatmul.msk.bf16.vlgmr.msra.gmra.mxu3 %vm423_vm3, %v446_v36  ;;  %v498_v50 = vpack.c.b16 %v497_v45, %v496_v47 }
 0x1cc   :  { %v400_v38 = vpop.permute.xlu1 %399 }
 0x1cd   :  { %v499_v40 = vunpack.c.l.b16 %v400_v38 }
 0x1ce   :  { %v414_v21 = vpop.permute.xlu0 %413 }
 0x1cf   :  { %v501_v41 = vpack.c.b16 %v500_v39, %v499_v40  ;;  %v713_v23 = vunpack.c.l.b16 %v414_v21 }
 0x1d1   :  { %v506_v43 = vsel %vm423_vm3, %v501_v41, 0 }
 0x1d2   :  { %515 = vmatpush.bf16.xpose.msrb.mxu3 %v506_v43 }
 0x1d4   :  { %v384_v46 = vpop.permute.xlu1 %383 }
 0x1d5   :  { %v471_v49 = vunpack.c.l.b16 %v384_v46 }
 0x1d6   :  { %v408_v24 = vpop.permute.xlu0 %407 }
 0x1d7   :  { %v472_v51 = vpack.c.b16 %v471_v49, %v470_v48  ;;  %v658_v26 = vunpack.c.l.b16 %v408_v24 }
 0x1d9   :  { %908 = vmatmul.msk.bf16.vlgmr.msrb.gmra.mxu2 %vm423_vm3, %v472_v51  ;;  %909 = vmatmul.msk.bf16.vlgmr.msrb.gmra.mxu3 %vm423_vm3, %v498_v50  ;;  %v439_v52 = vpop.f32.mrf.mxu2  ;;  %v659_v28 = vpack.c.b16 %v658_v26, %v657_v27 }
 0x1da   :  { %v1433_v32 = vsel %vm530_vm4, %v439_v52, -1e+30 }
 0x1db   :  { %v544_v33 = vsel %vm423_vm3, %v1433_v32, -inf }
 0x1dc   :  { %v410_v7 = vpop.permute.xlu1 %409 }
 0x1dd   :  { %v685_v10 = vunpack.c.l.b16 %v410_v7 }
 0x1df   :  { %v687_v15 = vpack.c.b16 %v686_v13, %v685_v10 }
 0x1e1   :  { %v441_v55 = vpop.f32.mrf.mxu2 }
 0x1e2   :  { %v1438_v34 = vsel %vm531_vm5, %v441_v55, -1e+30 }
 0x1e3   :  { %v547_v35 = vsel %vm423_vm3, %v1438_v34, -inf }
 0x1e4   :  { %v416_v12 = vpop.permute.xlu1 %415 }
 0x1e5   :  { %v714_v22 = vunpack.c.l.b16 %v416_v12 }
 0x1e7   :  { %v715_v17 = vpack.c.b16 %v714_v22, %v713_v23 }
 0x24c   :  { %v465_v53 = vpop.f32.mrf.mxu3 }
 0x24d   :  { %v538_v2 = vsel %vm530_vm4, %v465_v53, -1e+30 }
 0x24e   :  { %v550_v5 = vsel %vm423_vm3, %v538_v2, -inf }
 0x254   :  { %v467_v56 = vpop.f32.mrf.mxu3 }
 0x255   :  { %v539_v8 = vsel %vm531_vm5, %v467_v56, -1e+30 }
 0x256   :  { %v553_v11 = vsel %vm423_vm3, %v539_v8, -inf }
 0x25c   :  { %v491_v59 = vpop.f32.mrf.mxu2  ;;  %v517_v60 = vpop.f32.mrf.mxu3 }
 0x25d   :  { %v540_v61 = vsel %vm530_vm4, %v491_v59, -1e+30  ;;  %v542_v62 = vsel %vm530_vm4, %v517_v60, -1e+30 }
 0x25e   :  { %v562_v63 = vsel %vm423_vm3, %v542_v62, -inf  ;;  %v556_v0 = vsel %vm423_vm3, %v540_v61, -inf }
 0x25f   :  { %563 = vmax.xlane.f32.xlu0 %v562_v63  ;;  %557 = vmax.xlane.f32.xlu1 %v556_v0 }
 0x264   :  { %v493_v3 = vpop.f32.mrf.mxu2  ;;  %v519_v14 = vpop.f32.mrf.mxu3 }
 0x265   :  { %v541_v4 = vsel %vm531_vm5, %v493_v3, -1e+30  ;;  %v1422_v16 = vsel %vm531_vm5, %v519_v14, -1e+30 }
 0x266   :  { %v559_v6 = vsel %vm423_vm3, %v541_v4, -inf  ;;  %v565_v18 = vsel %vm423_vm3, %v1422_v16, -inf }
 0x267   :  { %551 = vmax.xlane.f32.xlu1 %v550_v5  ;;  %560 = vmax.xlane.f32.xlu2 %v559_v6 }
 0x26f   :  { %554 = vmax.xlane.f32.xlu2 %v553_v11 }
 0x273   :  { %688 = vrot.lane.b32.xlu0 %v687_v15, %s1219_s21 }
 0x277   :  { %566 = vmax.xlane.f32.xlu2 %v565_v18 }
 0x280   :  { %716 = vrot.lane.b32.xlu1 %v715_v17, %s1219_s21 }
 0x28f   :  { %660 = vrot.lane.b32.xlu2 %v659_v28, %s1219_s21 }
 0x297   :  { %632 = vrot.lane.b32.xlu2 %v631_v31, %s1219_s21  ;;  %s1235_s21 = smov 32  }
 0x29d   :  { %545 = vmax.xlane.f32.xlu0 %v544_v33 }
 0x2aa   :  { %548 = vmax.xlane.f32.xlu1 %v547_v35 }
 0x2d2   :  { %v558_v20 = vpop.xlane.xlu1 %557  ;;  %v564_v36 = vpop.xlane.xlu0 %563 }
 0x2d3   :  { %v572_v19 = vsub.f32 %v540_v61, %v558_v20  ;;  %v574_v38 = vsub.f32 %v542_v62, %v564_v36 }
 0x2d5   :  { %v584_v37 = vmul.f32 1.442695, %v572_v19  ;;  %v588_v39 = vmul.f32 1.442695, %v574_v38 }
 0x2d7   :  { %984 = vpow2.f32 %v584_v37 }
 0x2d8   :  { %986 = vpow2.f32 %v588_v39 }
 0x2da   :  { %v552_v40 = vpop.xlane.xlu1 %551  ;;  %v561_v41 = vpop.xlane.xlu2 %560 }
 0x2db   :  { %v570_v42 = vsub.f32 %v538_v2, %v552_v40  ;;  %v573_v43 = vsub.f32 %v541_v4, %v561_v41 }
 0x2dd   :  { %v580_v44 = vmul.f32 1.442695, %v570_v42  ;;  %v586_v45 = vmul.f32 1.442695, %v573_v43  ;;  %v985_v46 = vpop.eup %984 }
 0x2de   :  { %v604_v47 = vsel %vm423_vm3, %v985_v46, 0.0  ;;  %v987_v50 = vpop.eup %986  ;;  %v620_v52 = vpack.c.bf16 %v985_v46, %v985_v46 }
 0x2df   :  { %988 = vpow2.f32 %v580_v44  ;;  %605 = vadd.xlane.f32.xlu1 %v604_v47  ;;  %v610_v58 = vsel %vm423_vm3, %v987_v50, 0.0  ;;  %v622_v9 = vpack.c.bf16 %v987_v50, %v987_v50 }
 0x2e0   :  { %990 = vpow2.f32 %v586_v45  ;;  %v682_v59 = vunpack.c.l.b16 %v620_v52 }
 0x2e1   :  { %v710_v15 = vunpack.c.l.b16 %v622_v9 }
 0x2e2   :  { %v555_v48 = vpop.xlane.xlu2 %554 }
 0x2e3   :  { %v571_v49 = vsub.f32 %v539_v8, %v555_v48 }
 0x2e5   :  { %v989_v51 = vpop.eup %988  ;;  %v582_v53 = vmul.f32 1.442695, %v571_v49  ;;  %v689_v54 = vpop.permute.xlu0 %688 }
 0x2e6   :  { %v991_v55 = vpop.eup %990  ;;  %701 = vmatpush.bf16.msra.mxu2 %v689_v54  ;;  %v598_v56 = vsel %vm423_vm3, %v989_v51, 0.0  ;;  %v618_v2 = vpack.c.bf16 %v989_v51, %v989_v51 }
 0x2e7   :  { %v621_v57 = vpack.c.bf16 %v991_v55, %v991_v55  ;;  %992 = vpow2.f32 %v582_v53  ;;  %599 = vadd.xlane.f32.xlu2 %v598_v56  ;;  %611 = vadd.xlane.f32.xlu1 %v610_v58  ;;  %v607_v14 = vsel %vm423_vm3, %v991_v55, 0.0 }
 0x2e8   :  { %v654_v6 = vunpack.c.l.b16 %v618_v2 }
 0x2e9   :  { %v683_v60 = vunpack.c.l.b16 %v621_v57 }
 0x2ea   :  { %v567_v61 = vpop.xlane.xlu2 %566 }
 0x2eb   :  { %v684_v62 = vpack.c.b16 %v683_v60, %v682_v59  ;;  %v575_v63 = vsub.f32 %v1422_v16, %v567_v61  ;;  %v944_v61 = vld [vmem:[#allocation13 + $0x18] sm:$0xff] }
 0x2ed   :  { %v993_v0 = vpop.eup %992  ;;  %v590_v1 = vmul.f32 1.442695, %v575_v63  ;;  %912 = vmatmul.msk.bf16.vlgmr.msra.gmra.mxu2 %vm423_vm3, %v684_v62  ;;  %v943_v62 = vld [vmem:[#allocation13 + $0x10] sm:$0xff]  ;;  %v942_v63 = vld [vmem:[#allocation13 + $0x8] sm:$0xff] }
 0x2ee   :  { %v619_v3 = vpack.c.bf16 %v993_v0, %v993_v0  ;;  %v601_v4 = vsel %vm423_vm3, %v993_v0, 0.0  ;;  %v941_v0 = vld [vmem:[#allocation13] sm:$0xff] }
 0x2ef   :  { %994 = vpow2.f32 %v590_v1  ;;  %602 = vadd.xlane.f32.xlu0 %v601_v4 }
 0x2f0   :  { %v655_v5 = vunpack.c.l.b16 %v619_v3 }
 0x2f2   :  { %v717_v7 = vpop.permute.xlu1 %716  ;;  %v661_v8 = vpop.permute.xlu2 %660  ;;  %v656_v10 = vpack.c.b16 %v655_v5, %v654_v6 }
 0x2f3   :  { %673 = vmatpush.bf16.msrb.mxu1 %v661_v8  ;;  %729 = vmatpush.bf16.msra.mxu3 %v717_v7 }
 0x2f5   :  { %v995_v11 = vpop.eup %994 }
 0x2f6   :  { %v623_v13 = vpack.c.bf16 %v995_v11, %v995_v11  ;;  %911 = vmatmul.msk.bf16.vlgmr.msrb.gmra.mxu1 %vm423_vm3, %v656_v10  ;;  %v613_v21 = vsel %vm423_vm3, %v995_v11, 0.0 }
 0x2f7   :  { %608 = vadd.xlane.f32.xlu0 %v607_v14 }
 0x2f8   :  { %v711_v16 = vunpack.c.l.b16 %v623_v13 }
 0x2fa   :  { %v712_v18 = vpack.c.b16 %v711_v16, %v710_v15  ;;  %v633_v12 = vpop.permute.xlu2 %632 }
 0x2fb   :  { %645 = vmatpush.bf16.msrb.mxu0 %v633_v12 }
 0x2fc   :  { %913 = vmatmul.msk.bf16.vlgmr.msra.gmra.mxu3 %vm423_vm3, %v712_v18 }
 0x2ff   :  { %614 = vadd.xlane.f32.xlu0 %v613_v21  ;;  %828 = vmatpush.bf16.msra.mxu0 %v944_v61 }
 0x303   :  { %829 = vmatpush.bf16.msra.mxu0 %v943_v62 }
 0x307   :  { %830 = vmatpush.bf16.msra.mxu0 %v942_v63 }
 0x30b   :  { %831 = vmatpush.bf16.msra.mxu0 %v941_v0 }
 0x310   :  { %v546_v22 = vpop.xlane.xlu0 %545 }
 0x311   :  { %v568_v23 = vsub.f32 %v1433_v32, %v546_v22 }
 0x313   :  { %v576_v17 = vmul.f32 1.442695, %v568_v23 }
 0x315   :  { %996 = vpow2.f32 %v576_v17 }
 0x31b   :  { %v997_v24 = vpop.eup %996 }
 0x31c   :  { %v592_v25 = vsel %vm423_vm3, %v997_v24, 0.0  ;;  %v616_v29 = vpack.c.bf16 %v997_v24, %v997_v24 }
 0x31d   :  { %v549_v26 = vpop.xlane.xlu1 %548  ;;  %593 = vadd.xlane.f32.xlu2 %v592_v25 }
 0x31e   :  { %v569_v27 = vsub.f32 %v1438_v34, %v549_v26  ;;  %v626_v35 = vunpack.c.l.b16 %v616_v29 }
 0x320   :  { %v578_v28 = vmul.f32 1.442695, %v569_v27  ;;  %v983_v27 = vld [vmem:[%s1480_s9] ss:$0 sm:$0xff] }
 0x322   :  { %998 = vpow2.f32 %v578_v28 }
 0x328   :  { %v999_v30 = vpop.eup %998 }
 0x329   :  { %v617_v31 = vpack.c.bf16 %v999_v30, %v999_v30  ;;  %v595_v33 = vsel %vm423_vm3, %v999_v30, 0.0 }
 0x32a   :  { %596 = vadd.xlane.f32.xlu1 %v595_v33 }
 0x32b   :  { %v627_v20 = vunpack.c.l.b16 %v617_v31 }
 0x32d   :  { %v628_v32 = vpack.c.b16 %v627_v20, %v626_v35 }
 0x32f   :  { %910 = vmatmul.msk.bf16.vlgmr.msrb.gmra.mxu0 %vm423_vm3, %v628_v32 }
 0x352   :  { %v606_v19 = vpop.xlane.xlu1 %605 }
 0x353   :  { %1000 = vrcp.f32 %v606_v19 }
 0x359   :  { %v1001_v40 = vpop.eup %1000 }
 0x35a   :  { %v600_v39 = vpop.xlane.xlu2 %599  ;;  %v612_v51 = vpop.xlane.xlu1 %611 }
 0x362   :  { %v603_v36 = vpop.xlane.xlu0 %602 }
 0x36a   :  { %v609_v37 = vpop.xlane.xlu0 %608 }
 0x36b   :  { %1002 = vrcp.f32 %v609_v37 }
 0x36c   :  { %1004 = vrcp.f32 %v600_v39 }
 0x36d   :  { %1006 = vrcp.f32 %v603_v36 }
 0x36e   :  { %1008 = vrcp.f32 %v612_v51 }
 0x370   :  { %v703_v38 = vpop.f32.mrf.mxu2 }
 0x371   :  { %v1003_v41 = vpop.eup %1002  ;;  %v748_v43 = vmul.f32 %v1001_v40, %v703_v38 }
 0x372   :  { %v1005_v45 = vpop.eup %1004  ;;  %v615_v52 = vpop.xlane.xlu0 %614 }
 0x373   :  { %v675_v34 = vpop.f32.mrf.mxu1  ;;  %v1007_v46 = vpop.eup %1006  ;;  %1010 = vrcp.f32 %v615_v52 }
 0x374   :  { %v746_v49 = vmul.f32 %v1005_v45, %v675_v34  ;;  %v1009_v55 = vpop.eup %1008 }
 0x378   :  { %v705_v42 = vpop.f32.mrf.mxu2 }
 0x379   :  { %v749_v44 = vmul.f32 %v1003_v41, %v705_v42  ;;  %v1011_v56 = vpop.eup %1010 }
 0x37b   :  { %v971_v47 = vpack.i.bf16 %v749_v44, %v748_v43  ;;  %v677_v48 = vpop.f32.mrf.mxu1 }
 0x37c   :  { %v747_v50 = vmul.f32 %v1007_v46, %v677_v48 }
 0x37d   :  { %972 = vrot.lane.b32.xlu2 %v971_v47, %s1235_s21 }
 0x37e   :  { %v966_v53 = vpack.i.bf16 %v747_v50, %v746_v49 }
 0x37f   :  { %v731_v54 = vpop.f32.mrf.mxu3 }
 0x380   :  { %967 = vrot.lane.b32.xlu0 %v966_v53, %s1236_s14  ;;  %v750_v58 = vmul.f32 %v1009_v55, %v731_v54 }
 0x387   :  { %v733_v57 = vpop.f32.mrf.mxu3 }
 0x388   :  { %v751_v59 = vmul.f32 %v1011_v56, %v733_v57 }
 0x38a   :  { %v976_v60 = vpack.i.bf16 %v751_v59, %v750_v58 }
 0x38c   :  { %977 = vrot.lane.b32.xlu1 %v976_v60, %s1237_s15 }
 0x390   :  { %v594_v2 = vpop.xlane.xlu2 %593 }
 0x391   :  { %1012 = vrcp.f32 %v594_v2 }
 0x397   :  { %v1013_v6 = vpop.eup %1012 }
 0x39d   :  { %v597_v3 = vpop.xlane.xlu1 %596 }
 0x39e   :  { %1014 = vrcp.f32 %v597_v3 }
 0x3a4   :  { %v1015_v9 = vpop.eup %1014 }
 0x3ac   :  { %v647_v1 = vpop.f32.mrf.mxu0 }
 0x3ad   :  { %v744_v10 = vmul.f32 %v1013_v6, %v647_v1 }
 0x3b4   :  { %v649_v5 = vpop.f32.mrf.mxu0 }
 0x3b5   :  { %v745_v11 = vmul.f32 %v1015_v9, %v649_v5 }
 0x3d7   :  { %v973_v13 = vpop.permute.xlu2 %972 }
 0x3d8   :  { %v975_v16 = vunpack.i.h.bf16 %v973_v13  ;;  %v974_v18 = vunpack.i.l.bf16 %v973_v13 }
 0x3f2   :  { %v968_v4 = vpop.permute.xlu0 %967 }
 0x3f3   :  { %v970_v7 = vunpack.i.h.bf16 %v968_v4  ;;  %v969_v8 = vunpack.i.l.bf16 %v968_v4 }
 0x3f5   :  { %v777_v14 = vsel %vm423_vm3, %v745_v11, %v970_v7  ;;  %v776_v15 = vsel %vm423_vm3, %v744_v10, %v969_v8 }
 0x3f6   :  { %v779_v23 = vsel %vm778_vm6, %v776_v15, %v974_v18  ;;  %v780_v17 = vsel %vm778_vm6, %v777_v14, %v975_v16 }
 0x3fe   :  { %v978_v12 = vpop.permute.xlu1 %977 }
 0x3ff   :  { %v980_v21 = vunpack.i.h.bf16 %v978_v12  ;;  %v979_v22 = vunpack.i.l.bf16 %v978_v12 }
 0x401   :  { %v782_v24 = vsel %vm781_vm7, %v779_v23, %v979_v22  ;;  %v783_v25 = vsel %vm781_vm7, %v780_v17, %v980_v21 }
 0x402   :  { %v784_v26 = vpack.c.bf16 %v783_v25, %v782_v24 }
 0x404   :  { %930 = vmatmul.msk.bf16.vlgmr.msra.gmra.mxu0 %vm194_vm0, %v784_v26 }
 0x481   :  { %v833_v28 = vpop.f32.mrf.mxu0 }
 0x482   :  { %v834_v29 = vadd.f32 %v983_v27, %v833_v28 }
 0x484   :  { %838 = vst.msk [vmem:[#allocation14] sm:$0xff] %vm194_vm0, %v834_v29 }
 0x489   :  { %v835_v30 = vpop.f32.mrf.mxu0 }
 0x48a   :  { %v836_v31 = vadd.f32 %v983_v27, %v835_v30 }
 0x48c   :  { %839 = vst.msk [vmem:[#allocation14 + $0x8] sm:$0xff] %vm194_vm0, %v836_v31 }
 0x48d   :  { %852 = dma.vmem_to_hbm [thread:$0]  %s845_s18, 256, %s847_s20, [#allocation4], %s1222_s25, %s1222_s25, %s1223_s1  }
 0x48e   :  { %1216 = dma.done.wait [#allocation4], 256  }
 0x48f   :  { %1217 = vsyncadd [#allocation4], 4294967040 }
 0x490   :  { %857 = vsyncpa [#allocation3], 1 }
 0x491   :  { %858 = vsyncpa [#allocation6], 1 }
 0x492   :  { %859 = vsyncpa [#allocation9], 1 }
 0x493   :  { %860 = vsyncpa [#allocation12], 1 }
 0x494   :  { %861 = vsyncpa [#allocation4], 1 }

</bundles_post_ra>
